<compile_context>
chip_gen: v6e
topology: v6e:2x2x1
jax: 0.10.0
libtpu: 0.0.40
codegen_flags: <defaults>
</compile_context>

<pallas_src>
import jax
import jax.numpy as jnp
from jax.experimental import pallas as pl
from jax.experimental.pallas import tpu as pltpu


def _decoder_kernel(x_ref, w2_ref, b2_ref, w3_ref, b3_ref, out_ref):
    # fc2: (TM, D_in) @ (D_in, H) + (1, H), f32 accumulation on the MXU.
    h = jnp.dot(x_ref[...], w2_ref[...], preferred_element_type=jnp.float32)
    # Bias + ReLU in f32 on the VPU (no bf16 elementwise; safe on v5e).
    h = jnp.maximum(h + b2_ref[...], 0.0)
    # fc3: (TM, H) @ (H, D_out) + (1, D_out); keep h in f32.
    y = jnp.dot(h, w3_ref[...], preferred_element_type=jnp.float32)
    out_ref[...] = (y + b3_ref[...]).astype(out_ref.dtype)


def eegformer_decoder_for_binning(x, w2, b2, w3, b3, *, tile_m=4096):
    """x: (..., D_in); w2: (D_in, H); b2: (H,); w3: (H, D_out); b3: (D_out,)."""
    *lead, D_in = x.shape
    H = w2.shape[1]
    D_out = w3.shape[1]

    x2 = x.reshape(-1, D_in)
    B = x2.shape[0]
    b2r = b2.reshape(1, H)
    b3r = b3.reshape(1, D_out)

    itemsize = jnp.dtype(x.dtype).itemsize
    cost = pl.CostEstimate(
        flops=2 * B * (D_in * H + H * D_out),
        transcendentals=0,
        bytes_accessed=(x2.size + w2.size + b2r.size + w3.size + b3r.size
                        + B * D_out) * itemsize,
    )

    if B <= tile_m:
        # Single tile: no grid, no pipelining machinery — every operand is one
        # full block resident in VMEM.
        vmem_spec = pl.BlockSpec(memory_space=pltpu.MemorySpace.VMEM)
        out = pl.pallas_call(
            _decoder_kernel,
            out_shape=jax.ShapeDtypeStruct((B, D_out), x.dtype),
            in_specs=[vmem_spec] * 5,
            out_specs=vmem_spec,
            cost_estimate=cost,
        )(x2, w2, b2r, w3, b3r)
    else:
        # Tile over the batch axis ("parallel" -> shards across TensorCores on
        # v7x).  No padding: out_shape stays (B, D_out) and Pallas masks the
        # OOB writes of the ragged last block.  Tiles are rebalanced so grid
        # steps carry near-equal work.
        n_tiles = pl.cdiv(B, tile_m)
        tile = ((pl.cdiv(B, n_tiles) + 7) // 8) * 8   # balanced, sublane-aligned
        n_tiles = pl.cdiv(B, tile)
        out = pl.pallas_call(
            _decoder_kernel,
            out_shape=jax.ShapeDtypeStruct((B, D_out), x.dtype),
            grid=(n_tiles,),
            in_specs=[
                pl.BlockSpec((tile, D_in), lambda i: (i, 0)),
                pl.BlockSpec((D_in, H), lambda i: (0, 0)),   # VMEM-resident
                pl.BlockSpec((1, H), lambda i: (0, 0)),
                pl.BlockSpec((H, D_out), lambda i: (0, 0)),
                pl.BlockSpec((1, D_out), lambda i: (0, 0)),
            ],
            out_specs=pl.BlockSpec((tile, D_out), lambda i: (i, 0)),
            compiler_params=pltpu.CompilerParams(
                dimension_semantics=("parallel",)),
            cost_estimate=cost,
        )(x2, w2, b2r, w3, b3r)

    return out.reshape(*lead, D_out)


def reference(x, w2, b2, w3, b3):
    h = jnp.maximum(x @ w2 + b2, 0.0)
    return h @ w3 + b3


if __name__ == "__main__":
    # Small shapes consistent with the module: input_dim=64, hidden_dim=32,
    # output_dim=16.
    D_in, H, D_out = 64, 32, 16

    key = jax.random.PRNGKey(0)
    kx, kxb, k2w, k2b, k3w, k3b = jax.random.split(key, 6)

    # Deterministic parameter init (PyTorch Linear stores (out, in); we keep
    # the transposed (in, out) layout for the kernel).
    w2 = jax.random.normal(k2w, (D_in, H), dtype=jnp.float32) * (1.0 / jnp.sqrt(D_in))
    b2 = jax.random.normal(k2b, (H,), dtype=jnp.float32) * 0.01
    w3 = jax.random.normal(k3w, (H, D_out), dtype=jnp.float32) * (1.0 / jnp.sqrt(H))
    b3 = jax.random.normal(k3b, (D_out,), dtype=jnp.float32) * 0.01

    # Path 1: tiny batch -> gridless single-block call.
    x_small = jax.random.normal(kx, (4, D_in), dtype=jnp.float32)
    out_small = eegformer_decoder_for_binning(x_small, w2, b2, w3, b3)

    # Path 2: batched input with leading dims -> tiled "parallel" grid with
    # VMEM-resident weights.  tile_m is forced small here so the multi-tile +
    # ragged-last-block (OOB-masked store) path is exercised at small shapes:
    # B = 2*301 = 602 -> balanced tile = 128, 5 grid steps, last step ragged.
    x_big = jax.random.normal(kxb, (2, 301, D_in), dtype=jnp.float32)
    out_big = eegformer_decoder_for_binning(x_big, w2, b2, w3, b3, tile_m=128)

    out_small, out_big = jax.block_until_ready((out_small, out_big))

    ref_small = reference(x_small, w2, b2, w3, b3)
    ref_big = reference(x_big, w2, b2, w3, b3)

    assert out_small.shape == (4, D_out)
    assert out_big.shape == (2, 301, D_out)
    assert jnp.allclose(out_small, ref_small, atol=1e-4, rtol=1e-4), "small mismatch"
    assert jnp.allclose(out_big, ref_big, atol=1e-4, rtol=1e-4), "batched mismatch"

    print("KERNEL_OK")
</pallas_src>

<mosaic_0001>
module attributes {stable_mosaic.version = 11 : i64} {
  func.func @_decoder_kernel(%arg0: memref<4x64xf32, #tpu.memory_space<vmem>>, %arg1: memref<64x32xf32, #tpu.memory_space<vmem>>, %arg2: memref<1x32xf32, #tpu.memory_space<vmem>>, %arg3: memref<32x16xf32, #tpu.memory_space<vmem>>, %arg4: memref<1x16xf32, #tpu.memory_space<vmem>>, %arg5: memref<4x16xf32, #tpu.memory_space<vmem>>) attributes {dimension_semantics = [], scalar_prefetch = 0 : i64, scratch_operands = 0 : i64, tpu.core_type = #tpu.core_type<tc>} {
    %c0 = arith.constant 0 : index
    %c0_0 = arith.constant 0 : index
    %0 = vector.load %arg0[%c0, %c0_0] : memref<4x64xf32, #tpu.memory_space<vmem>>, vector<4x64xf32>
    %c0_1 = arith.constant 0 : index
    %c0_2 = arith.constant 0 : index
    %1 = vector.load %arg1[%c0_1, %c0_2] : memref<64x32xf32, #tpu.memory_space<vmem>>, vector<64x32xf32>
    %cst = arith.constant dense<0.000000e+00> : vector<4x32xf32>
    %2 = tpu.matmul %0, %1, %cst {dimension_numbers = #tpu.dot_dimension_numbers<[1], [0], [0], [1], [0, 0, 1, 1], [], []>} : vector<4x64xf32>, vector<64x32xf32>, vector<4x32xf32> -> vector<4x32xf32>
    %c0_3 = arith.constant 0 : index
    %c0_4 = arith.constant 0 : index
    %3 = vector.load %arg2[%c0_3, %c0_4] : memref<1x32xf32, #tpu.memory_space<vmem>>, vector<1x32xf32>
    %4 = vector.broadcast %3 : vector<1x32xf32> to vector<4x32xf32>
    %5 = arith.addf %2, %4 : vector<4x32xf32>
    %cst_5 = arith.constant 0.000000e+00 : f32
    %6 = vector.broadcast %cst_5 : f32 to vector<4x32xf32>
    %7 = arith.maximumf %5, %6 : vector<4x32xf32>
    %c0_6 = arith.constant 0 : index
    %c0_7 = arith.constant 0 : index
    %8 = vector.load %arg3[%c0_6, %c0_7] : memref<32x16xf32, #tpu.memory_space<vmem>>, vector<32x16xf32>
    %cst_8 = arith.constant dense<0.000000e+00> : vector<4x16xf32>
    %9 = tpu.matmul %7, %8, %cst_8 {dimension_numbers = #tpu.dot_dimension_numbers<[1], [0], [0], [1], [0, 0, 1, 1], [], []>} : vector<4x32xf32>, vector<32x16xf32>, vector<4x16xf32> -> vector<4x16xf32>
    %c0_9 = arith.constant 0 : index
    %c0_10 = arith.constant 0 : index
    %10 = vector.load %arg4[%c0_9, %c0_10] : memref<1x16xf32, #tpu.memory_space<vmem>>, vector<1x16xf32>
    %11 = vector.broadcast %10 : vector<1x16xf32> to vector<4x16xf32>
    %12 = arith.addf %9, %11 : vector<4x16xf32>
    %c0_11 = arith.constant 0 : index
    %c0_12 = arith.constant 0 : index
    %13 = vector.load %arg5[%c0_11, %c0_12] : memref<4x16xf32, #tpu.memory_space<vmem>>, vector<4x16xf32>
    tpu.vector_store %arg5[%c0_11, %c0_12], %12 {strides = array<i32>} : memref<4x16xf32, #tpu.memory_space<vmem>>, vector<4x16xf32>,
    return
  }
}

</mosaic_0001>

<bundles_post_ra>
// kernel: tpu_custom_call.1
= control target key start
LH: loop header
LB: loop body
LE: loop exit
PB: predicated region body
PF: predicated region fallthrough
CT: control target
= control target key end

     0   :  { %v286_v1 = vmov 0.0   ;;  %vm287_vm0 = vmmov 0   ;;  %s367_s0 = inlined_call_operand.vmem [shape: f32[4,64], index: 0, kind: input, shape index: {}]   ;;  %s368_s1 = inlined_call_operand.vmem [shape: f32[64,32], index: 1, kind: input, shape index: {}]   ;;  %s369_s2 = inlined_call_operand.vmem [shape: f32[1,32], index: 2, kind: input, shape index: {}]   ;;  %s370_s3 = inlined_call_operand.vmem [shape: f32[32,16], index: 3, kind: input, shape index: {}]   ;;  %s371_s4 = inlined_call_operand.vmem [shape: f32[1,16], index: 4, kind: input, shape index: {}]   ;;  %s372_s5 = inlined_call_operand.hbm [shape: f32[4,16], index: 5, kind: output, shape index: {}]  }
   0x1   :  { %v29_v0 = vld [vmem:[%s368_s1 + $0x38] sm:$0xff]  ;;  %231 = vmatprep.subr.mxu0 %v286_v1  ;;  %v28_v2 = vld [vmem:[%s368_s1 + $0x30] sm:$0xff]  ;;  %247 = vmatprep.mubr.msk.f32.mxu0 %vm287_vm0, %v286_v1  ;;  %v27_v3 = vld [vmem:[%s368_s1 + $0x28] sm:$0xff] }
   0x2   :  { %232 = vmatpush3.msra.mxu0 %v29_v0  ;;  %250 = vmatprep.subr.mxu1 %v286_v1  ;;  %v115_v4 = vld [vmem:[%s370_s3 + $0x18] sm:$0xff] }
   0x3   :  { %233 = vmatprep.subr.mxu0 %v286_v1  ;;  %258 = vmatprep.mubr.msk.f32.mxu1 %vm287_vm0, %v286_v1 }
   0x4   :  { %10 = vsyncpa [#allocation3], 0  ;;  %234 = vmatpush3.msra.mxu0 %v28_v2  ;;  %251 = vmatpush3.msra.mxu1 %v115_v4  ;;  %v26_v5 = vld [vmem:[%s368_s1 + $0x20] sm:$0xff]  ;;  %v25_v6 = vld [vmem:[%s368_s1 + $0x18] sm:$0xff]  ;;  %vm37_vm1 = vcmask 523264   ;;  %vm123_vm2 = vcmask 261120  }
   0x5   :  { %235 = vmatprep.subr.mxu0 %v286_v1  ;;  %252 = vmatprep.subr.mxu1 %v286_v1  ;;  %v24_v7 = vld [vmem:[%s368_s1 + $0x10] sm:$0xff]  ;;  %v23_v8 = vld [vmem:[%s368_s1 + $0x8] sm:$0xff]  ;;  %v22_v9 = vld [vmem:[%s368_s1] sm:$0xff]  ;;  %s288_s21 = smov [#allocation2]   ;;  %vm197_vm3 = vcmask 125952  }
   0x6   :  { %236 = vmatpush3.msra.mxu0 %v27_v3  ;;  %v21_v10 = vld [vmem:[%s367_s0] sm:$0xf]  ;;  %v114_v11 = vld [vmem:[%s370_s3 + $0x10] sm:$0xff]  ;;  %v113_v12 = vld [vmem:[%s370_s3 + $0x8] sm:$0xff]  ;;  %s205_s22 = sshll.u32 %s288_s21, 4  ;;  %s206_s22 = int_to_ptr.vmem [resolvable:$true] %s205_s22 }
   0x7   :  { %237 = vmatprep.subr.mxu0 %v286_v1  ;;  %253 = vmatpush3.msra.mxu1 %v114_v11  ;;  %v112_v13 = vld [vmem:[%s370_s3] sm:$0xff]  ;;  %s264_s3 = scalar_lea.vmem %s206_s22, 64  ;;  %p269_p1 = scmp.lt.s32.totalorder %s206_s22, %s206_s22 }
   0x8   :  { %238 = vmatpush3.msra.mxu0 %v26_v5  ;;  %254 = vmatprep.subr.mxu1 %v286_v1  ;;  %v213_v14 = vld [vmem:[%s369_s2] ss:$0 sm:$0xff]  ;;  %p265_p0 = scmp.ne.s32.totalorder %s206_s22, %s264_s3  ;;  %p270_p2 = scmp.lt.s32.totalorder %s264_s3, %s264_s3 }
   0x9   :  { %239 = vmatprep.subr.mxu0 %v286_v1  ;;  %255 = vmatpush3.msra.mxu1 %v113_v12  ;;  %v215_v19 = vld [vmem:[%s371_s4] ss:$0 sm:$0xff] }
   0xa   :  { %240 = vmatpush3.msra.mxu0 %v25_v6  ;;  %256 = vmatprep.subr.mxu1 %v286_v1  ;;  %p271_p3 = por %p270_p2, %p269_p1 }
   0xb   :  { %241 = vmatprep.subr.mxu0 %v286_v1  ;;  %257 = vmatpush3.msra.mxu1 %v112_v13 }
   0xc   :  { %242 = vmatpush3.msra.mxu0 %v24_v7  ;;  %p272_p4 = pnand %p271_p3, %p265_p0 }
   0xd   :  { %243 = vmatprep.subr.mxu0 %v286_v1 }
   0xe   :  { %244 = vmatpush3.msra.mxu0 %v23_v8 }
   0xf   :  { %245 = vmatprep.subr.mxu0 %v286_v1 }
  0x10   :  { %246 = vmatpush3.msra.mxu0 %v22_v9 }
  0x11   :  { %248 = vmatmul.mubr.msk.f32.vlgmr.msra.gmra.mxu0 %vm37_vm1, %v21_v10 }
  0xd1   :  { %v107_v15 = vpop.f32.mrf.mxu0 }
  0xd2   :  { %v108_v16 = vadd.f32 %v213_v14, %v107_v15 }
  0xd3   :  { %v249_v17 = vpop.f32.mrf.mxu0 }
  0xd4   :  { %v111_v18 = vmax.f32 %v108_v16, 0.0 }
  0xd6   :  { %259 = vmatmul.mubr.msk.f32.vlgmr.msra.gmra.mxu1 %vm123_vm2, %v111_v18 }
 0x196   :  { %v193_v20 = vpop.f32.mrf.mxu1 }
 0x197   :  { %v194_v21 = vadd.f32 %v215_v19, %v193_v20 }
 0x198   :  { %v260_v22 = vpop.f32.mrf.mxu1 }
 0x199   :  { %198 = vst.msk [vmem:[#allocation2] sm:$0xf] %vm197_vm3, %v194_v21 }
 0x19a   :  { %275 = shalt.err (!%p272_p4)
}
 0x19b   :  { %208 = dma.vmem_to_hbm [thread:$0]  %s206_s22, 64, %s372_s5, [#allocation3]  }
 0x19c   :  { %284 = dma.done.wait [#allocation3], 64  }
 0x19d   :  { %285 = vsyncadd [#allocation3], 4294967232 }
 0x19e   :  { %212 = vsyncpa [#allocation3], 1 }

</bundles_post_ra>
